<compile_context>
chip_gen: v7x
topology: tpu7x:2x2x1
jax: 0.10.0
libtpu: 0.0.40
codegen_flags: <defaults>
</compile_context>

<pallas_src>
import math
from functools import partial

import jax
import jax.numpy as jnp
from jax import lax
from jax.experimental import pallas as pl
from jax.experimental.pallas import tpu as pltpu

EPS = 1e-5
_VMEM_LIMIT = 32 * 1024 * 1024          # safe scoped-VMEM request on v5e/v6e/v7x
_TILE_TARGET_BYTES = 2 * 1024 * 1024    # ~2 MiB of fp32 per x block
_MAX_TILE_ROWS = 1024


def _round_up(x, m):
    return (x + m - 1) // m * m


def _choose_row_tile(n_rows, d):
    """Largest multiple-of-8 row tile <= ~2 MiB fp32 and <= padded row count."""
    rows = _TILE_TARGET_BYTES // max(d * 4, 1)
    rows = max(8, min(_MAX_TILE_ROWS, (rows // 8) * 8))
    return min(rows, _round_up(n_rows, 8))


# -----------------------------------------------------------------------------
# Kernels
# -----------------------------------------------------------------------------
def _affine_apply_kernel(x_ref, scale_ref, shift_ref, o_ref):
    # y = x * scale + shift ; scale/shift broadcast over the row axis.
    x = x_ref[...].astype(jnp.float32)
    o_ref[...] = (x * scale_ref[...] + shift_ref[...]).astype(o_ref.dtype)


def _bn_stats_kernel(x_ref, g_ref, b_ref, scale_ref, shift_ref,
                     sum_sc, sumsq_sc, *, inv_n, groups, d):
    # Batch-norm stats: grid=(row_tiles,), x block (tile, d), accumulators (8, d).
    i = pl.program_id(0)

    @pl.when(i == 0)
    def _():
        sum_sc[...] = jnp.zeros_like(sum_sc)
        sumsq_sc[...] = jnp.zeros_like(sumsq_sc)

    # Single pass over the tile: sum and sum-of-squares.  The (groups, 8, d)
    # regroup keeps per-tile reduction as vreg-wise VPU adds; only the final
    # 8-row reduce in the finalize block uses a cross-sublane reduction.
    x = x_ref[...].astype(jnp.float32).reshape(groups, 8, d)
    sum_sc[...] += jnp.sum(x, axis=0)
    sumsq_sc[...] += jnp.sum(x * x, axis=0)

    @pl.when(i == pl.num_programs(0) - 1)
    def _():
        mean = jnp.sum(sum_sc[...], axis=0, keepdims=True) * inv_n        # (1, d)
        ex2 = jnp.sum(sumsq_sc[...], axis=0, keepdims=True) * inv_n
        var = jnp.maximum(ex2 - mean * mean, 0.0)                         # biased var
        inv = lax.rsqrt(var + EPS)
        g = g_ref[...].astype(jnp.float32)
        b = b_ref[...].astype(jnp.float32)
        scale = g * inv
        scale_ref[...] = scale
        shift_ref[...] = b - mean * scale


def _in_stats_kernel(x_ref, g_ref, b_ref, scale_ref, shift_ref,
                     sum_sc, sumsq_sc, *, inv_n, groups, d):
    # Instance-norm stats: grid=(B, seq_tiles), x block (1, tile, d),
    # per-b accumulators (8, d) reset at the start of each b's seq loop.
    s = pl.program_id(1)

    @pl.when(s == 0)
    def _():
        sum_sc[...] = jnp.zeros_like(sum_sc)
        sumsq_sc[...] = jnp.zeros_like(sumsq_sc)

    x = x_ref[...].astype(jnp.float32).reshape(groups, 8, d)
    sum_sc[...] += jnp.sum(x, axis=0)
    sumsq_sc[...] += jnp.sum(x * x, axis=0)

    @pl.when(s == pl.num_programs(1) - 1)
    def _():
        mean = jnp.sum(sum_sc[...], axis=0, keepdims=True) * inv_n        # (1, d)
        ex2 = jnp.sum(sumsq_sc[...], axis=0, keepdims=True) * inv_n
        var = jnp.maximum(ex2 - mean * mean, 0.0)
        inv = lax.rsqrt(var + EPS)
        g = g_ref[...].astype(jnp.float32)                                # (1, 1, d)
        b = b_ref[...].astype(jnp.float32)
        scale = g * inv[None]                                             # (1, 1, d)
        scale_ref[...] = scale
        shift_ref[...] = b - mean[None] * scale


# -----------------------------------------------------------------------------
# Wrappers
# -----------------------------------------------------------------------------
def batch_normalization(x, gamma, beta):
    """BatchNorm1d (training-mode) semantics for x of shape (B, S, D)."""
    B, S, D = x.shape
    N = B * S
    x2 = x.reshape(N, D)

    tile = _choose_row_tile(N, D)
    n_pad = _round_up(N, tile)
    if n_pad != N:
        x2 = jnp.pad(x2, ((0, n_pad - N), (0, 0)))   # zero rows: stats-safe
    n_tiles = n_pad // tile
    # TODO(synk): for best store lane-density keep embed_dim a multiple of 128
    # (the usual production setting); small D falls back to masked stores.

    g2 = gamma.reshape(1, D)
    b2 = beta.reshape(1, D)
    itemsize = x2.dtype.itemsize

    stats_kernel = partial(_bn_stats_kernel, inv_n=1.0 / N, groups=tile // 8, d=D)
    scale, shift = pl.pallas_call(
        stats_kernel,
        out_shape=(jax.ShapeDtypeStruct((1, D), jnp.float32),
                   jax.ShapeDtypeStruct((1, D), jnp.float32)),
        grid_spec=pltpu.PrefetchScalarGridSpec(
            num_scalar_prefetch=0,
            grid=(n_tiles,),
            in_specs=[
                pl.BlockSpec((tile, D), lambda i: (i, 0)),
                pl.BlockSpec((1, D), lambda i: (0, 0)),
                pl.BlockSpec((1, D), lambda i: (0, 0)),
            ],
            out_specs=(
                pl.BlockSpec((1, D), lambda i: (0, 0)),
                pl.BlockSpec((1, D), lambda i: (0, 0)),
            ),
            scratch_shapes=[pltpu.VMEM((8, D), jnp.float32),
                            pltpu.VMEM((8, D), jnp.float32)],
        ),
        compiler_params=pltpu.CompilerParams(
            dimension_semantics=("arbitrary",),
            vmem_limit_bytes=_VMEM_LIMIT),
        cost_estimate=pl.CostEstimate(
            flops=3 * n_pad * D, transcendentals=0,
            bytes_accessed=n_pad * D * itemsize),
    )(x2, g2, b2)

    out = pl.pallas_call(
        _affine_apply_kernel,
        out_shape=jax.ShapeDtypeStruct((n_pad, D), x.dtype),
        grid_spec=pltpu.PrefetchScalarGridSpec(
            num_scalar_prefetch=0,
            grid=(n_tiles,),
            in_specs=[
                pl.BlockSpec((tile, D), lambda i: (i, 0)),
                pl.BlockSpec((1, D), lambda i: (0, 0)),
                pl.BlockSpec((1, D), lambda i: (0, 0)),
            ],
            out_specs=pl.BlockSpec((tile, D), lambda i: (i, 0)),
        ),
        compiler_params=pltpu.CompilerParams(
            dimension_semantics=("parallel",),
            vmem_limit_bytes=_VMEM_LIMIT),
        cost_estimate=pl.CostEstimate(
            flops=2 * n_pad * D, transcendentals=0,
            bytes_accessed=2 * n_pad * D * itemsize),
    )(x2, scale, shift)

    if n_pad != N:
        out = out[:N]
    return out.reshape(B, S, D)


def instance_normalization(x, gamma, beta):
    """InstanceNorm1d semantics (normalize over seq axis per (b, d)) for (B, S, D)."""
    B, S, D = x.shape

    tile = _choose_row_tile(S, D)
    s_pad = _round_up(S, tile)
    xp = x
    if s_pad != S:
        xp = jnp.pad(x, ((0, 0), (0, s_pad - S), (0, 0)))   # zero rows: stats-safe
    n_tiles = s_pad // tile

    g3 = gamma.reshape(1, 1, D)
    b3 = beta.reshape(1, 1, D)
    itemsize = xp.dtype.itemsize

    stats_kernel = partial(_in_stats_kernel, inv_n=1.0 / S, groups=tile // 8, d=D)
    scale, shift = pl.pallas_call(
        stats_kernel,
        out_shape=(jax.ShapeDtypeStruct((B, 1, D), jnp.float32),
                   jax.ShapeDtypeStruct((B, 1, D), jnp.float32)),
        grid_spec=pltpu.PrefetchScalarGridSpec(
            num_scalar_prefetch=0,
            grid=(B, n_tiles),
            in_specs=[
                pl.BlockSpec((1, tile, D), lambda b, s: (b, s, 0)),
                pl.BlockSpec((1, 1, D), lambda b, s: (0, 0, 0)),
                pl.BlockSpec((1, 1, D), lambda b, s: (0, 0, 0)),
            ],
            out_specs=(
                pl.BlockSpec((1, 1, D), lambda b, s: (b, 0, 0)),
                pl.BlockSpec((1, 1, D), lambda b, s: (b, 0, 0)),
            ),
            scratch_shapes=[pltpu.VMEM((8, D), jnp.float32),
                            pltpu.VMEM((8, D), jnp.float32)],
        ),
        compiler_params=pltpu.CompilerParams(
            dimension_semantics=("parallel", "arbitrary"),
            vmem_limit_bytes=_VMEM_LIMIT),
        cost_estimate=pl.CostEstimate(
            flops=3 * B * s_pad * D, transcendentals=0,
            bytes_accessed=B * s_pad * D * itemsize),
    )(xp, g3, b3)

    out = pl.pallas_call(
        _affine_apply_kernel,
        out_shape=jax.ShapeDtypeStruct((B, s_pad, D), x.dtype),
        grid_spec=pltpu.PrefetchScalarGridSpec(
            num_scalar_prefetch=0,
            grid=(B, n_tiles),
            in_specs=[
                pl.BlockSpec((1, tile, D), lambda b, s: (b, s, 0)),
                pl.BlockSpec((1, 1, D), lambda b, s: (b, 0, 0)),
                pl.BlockSpec((1, 1, D), lambda b, s: (b, 0, 0)),
            ],
            out_specs=pl.BlockSpec((1, tile, D), lambda b, s: (b, s, 0)),
        ),
        compiler_params=pltpu.CompilerParams(
            dimension_semantics=("parallel", "parallel"),
            vmem_limit_bytes=_VMEM_LIMIT),
        cost_estimate=pl.CostEstimate(
            flops=2 * B * s_pad * D, transcendentals=0,
            bytes_accessed=2 * B * s_pad * D * itemsize),
    )(xp, scale, shift)

    if s_pad != S:
        out = out[:, :S]
    return out


def normalization_forward(x, gamma, beta, normalization="batch"):
    if normalization == "batch":
        return batch_normalization(x, gamma, beta)
    elif normalization == "instance":
        return instance_normalization(x, gamma, beta)
    else:
        return x


# -----------------------------------------------------------------------------
# Pure-JAX references (for verification)
# -----------------------------------------------------------------------------
def _ref_batch(x, gamma, beta):
    B, S, D = x.shape
    x2 = x.reshape(-1, D).astype(jnp.float32)
    mean = jnp.mean(x2, axis=0, keepdims=True)
    var = jnp.mean((x2 - mean) ** 2, axis=0, keepdims=True)
    y = (x2 - mean) / jnp.sqrt(var + EPS) * gamma + beta
    return y.reshape(B, S, D).astype(x.dtype)


def _ref_instance(x, gamma, beta):
    xf = x.astype(jnp.float32)
    mean = jnp.mean(xf, axis=1, keepdims=True)
    var = jnp.mean((xf - mean) ** 2, axis=1, keepdims=True)
    y = (xf - mean) / jnp.sqrt(var + EPS) * gamma.reshape(1, 1, -1) + beta.reshape(1, 1, -1)
    return y.astype(x.dtype)


# -----------------------------------------------------------------------------
if __name__ == "__main__":
    B, S, D = 2, 8, 32  # batch, seq, embed_dim

    key = jax.random.PRNGKey(0)
    kx, kg, kb = jax.random.split(key, 3)

    x = jax.random.normal(kx, (B, S, D), dtype=jnp.float32)

    # Deterministic parameter init matching Normalization.init_parameters():
    # uniform(-stdv, stdv) with stdv = 1 / sqrt(embed_dim).
    stdv = 1.0 / math.sqrt(D)
    gamma = jax.random.uniform(kg, (D,), minval=-stdv, maxval=stdv, dtype=jnp.float32)
    beta = jax.random.uniform(kb, (D,), minval=-stdv, maxval=stdv, dtype=jnp.float32)

    # 'batch' path (default normalizer in the module)
    y_batch = normalization_forward(x, gamma, beta, normalization="batch")
    jax.block_until_ready(y_batch)
    assert jnp.allclose(y_batch, _ref_batch(x, gamma, beta), atol=1e-4, rtol=1e-4)

    # 'instance' path
    y_inst = normalization_forward(x, gamma, beta, normalization="instance")
    jax.block_until_ready(y_inst)
    assert jnp.allclose(y_inst, _ref_instance(x, gamma, beta), atol=1e-4, rtol=1e-4)

    print("KERNEL_OK")
</pallas_src>

<mosaic_0001>
module attributes {stable_mosaic.version = 11 : i64} {
  func.func @_bn_stats_kernel(%arg0: i32, %arg1: memref<16x32xf32, #tpu.memory_space<vmem>>, %arg2: memref<1x32xf32, #tpu.memory_space<vmem>>, %arg3: memref<1x32xf32, #tpu.memory_space<vmem>>, %arg4: memref<1x32xf32, #tpu.memory_space<vmem>>, %arg5: memref<1x32xf32, #tpu.memory_space<vmem>>, %arg6: memref<8x32xf32, #tpu.memory_space<vmem>>, %arg7: memref<8x32xf32, #tpu.memory_space<vmem>>) attributes {dimension_semantics = [#tpu.dimension_semantics<arbitrary>], iteration_bounds = array<i64: 1>, scalar_prefetch = 0 : i64, scratch_operands = 2 : i64, tpu.core_type = #tpu.core_type<tc>, window_params = [{transform_indices = @transform_0, window_bounds = array<i64: 16, 32>}, {pipeline_mode = #tpu.pipeline_mode<synchronous>, transform_indices = @transform_1, window_bounds = array<i64: 1, 32>}, {pipeline_mode = #tpu.pipeline_mode<synchronous>, transform_indices = @transform_2, window_bounds = array<i64: 1, 32>}, {pipeline_mode = #tpu.pipeline_mode<synchronous>, transform_indices = @transform_3, window_bounds = array<i64: 1, 32>}, {pipeline_mode = #tpu.pipeline_mode<synchronous>, transform_indices = @transform_4, window_bounds = array<i64: 1, 32>}]} {
    %c0_i32 = arith.constant 0 : i32
    %0 = arith.cmpi eq, %arg0, %c0_i32 : i32
    %1 = arith.extui %0 : i1 to i32
    %c0_i32_0 = arith.constant 0 : i32
    %2 = arith.cmpi ne, %1, %c0_i32_0 : i32
    scf.if %2 {
      %cst_13 = arith.constant 0.000000e+00 : f32
      %17 = vector.broadcast %cst_13 : f32 to vector<8x32xf32>
      %c0_14 = arith.constant 0 : index
      %c0_15 = arith.constant 0 : index
      %18 = vector.load %arg6[%c0_14, %c0_15] : memref<8x32xf32, #tpu.memory_space<vmem>>, vector<8x32xf32>
      tpu.vector_store %arg6[%c0_14, %c0_15], %17 {strides = array<i32>} : memref<8x32xf32, #tpu.memory_space<vmem>>, vector<8x32xf32>,
      %cst_16 = arith.constant 0.000000e+00 : f32
      %19 = vector.broadcast %cst_16 : f32 to vector<8x32xf32>
      %c0_17 = arith.constant 0 : index
      %c0_18 = arith.constant 0 : index
      %20 = vector.load %arg7[%c0_17, %c0_18] : memref<8x32xf32, #tpu.memory_space<vmem>>, vector<8x32xf32>
      tpu.vector_store %arg7[%c0_17, %c0_18], %19 {strides = array<i32>} : memref<8x32xf32, #tpu.memory_space<vmem>>, vector<8x32xf32>,
    } else {
    }
    %c0 = arith.constant 0 : index
    %c0_1 = arith.constant 0 : index
    %3 = vector.load %arg1[%c0, %c0_1] : memref<16x32xf32, #tpu.memory_space<vmem>>, vector<16x32xf32>
    %4 = vector.shape_cast %3 : vector<16x32xf32> to vector<2x8x32xf32>
    %c0_2 = arith.constant 0 : index
    %c0_3 = arith.constant 0 : index
    %5 = vector.load %arg6[%c0_2, %c0_3] : memref<8x32xf32, #tpu.memory_space<vmem>>, vector<8x32xf32>
    %cst = arith.constant dense<0.000000e+00> : vector<8x32xf32>
    %6 = vector.multi_reduction <add>, %4, %cst [0] : vector<2x8x32xf32> to vector<8x32xf32>
    %7 = arith.addf %5, %6 : vector<8x32xf32>
    %c0_4 = arith.constant 0 : index
    %c0_5 = arith.constant 0 : index
    %8 = vector.load %arg6[%c0_4, %c0_5] : memref<8x32xf32, #tpu.memory_space<vmem>>, vector<8x32xf32>
    tpu.vector_store %arg6[%c0_4, %c0_5], %7 {strides = array<i32>} : memref<8x32xf32, #tpu.memory_space<vmem>>, vector<8x32xf32>,
    %c0_6 = arith.constant 0 : index
    %c0_7 = arith.constant 0 : index
    %9 = vector.load %arg7[%c0_6, %c0_7] : memref<8x32xf32, #tpu.memory_space<vmem>>, vector<8x32xf32>
    %10 = arith.mulf %4, %4 : vector<2x8x32xf32>
    %cst_8 = arith.constant dense<0.000000e+00> : vector<8x32xf32>
    %11 = vector.multi_reduction <add>, %10, %cst_8 [0] : vector<2x8x32xf32> to vector<8x32xf32>
    %12 = arith.addf %9, %11 : vector<8x32xf32>
    %c0_9 = arith.constant 0 : index
    %c0_10 = arith.constant 0 : index
    %13 = vector.load %arg7[%c0_9, %c0_10] : memref<8x32xf32, #tpu.memory_space<vmem>>, vector<8x32xf32>
    tpu.vector_store %arg7[%c0_9, %c0_10], %12 {strides = array<i32>} : memref<8x32xf32, #tpu.memory_space<vmem>>, vector<8x32xf32>,
    %c0_i32_11 = arith.constant 0 : i32
    %14 = arith.cmpi eq, %arg0, %c0_i32_11 : i32
    %15 = arith.extui %14 : i1 to i32
    %c0_i32_12 = arith.constant 0 : i32
    %16 = arith.cmpi ne, %15, %c0_i32_12 : i32
    scf.if %16 {
      %c0_13 = arith.constant 0 : index
      %c0_14 = arith.constant 0 : index
      %17 = vector.load %arg6[%c0_13, %c0_14] : memref<8x32xf32, #tpu.memory_space<vmem>>, vector<8x32xf32>
      %cst_15 = arith.constant dense<0.000000e+00> : vector<32xf32>
      %18 = vector.multi_reduction <add>, %17, %cst_15 [0] : vector<8x32xf32> to vector<32xf32>
      %19 = vector.shape_cast %18 : vector<32xf32> to vector<1x32xf32>
      %cst_16 = arith.constant 6.250000e-02 : f32
      %20 = vector.broadcast %cst_16 : f32 to vector<1x32xf32>
      %21 = arith.mulf %19, %20 : vector<1x32xf32>
      %c0_17 = arith.constant 0 : index
      %c0_18 = arith.constant 0 : index
      %22 = vector.load %arg7[%c0_17, %c0_18] : memref<8x32xf32, #tpu.memory_space<vmem>>, vector<8x32xf32>
      %cst_19 = arith.constant dense<0.000000e+00> : vector<32xf32>
      %23 = vector.multi_reduction <add>, %22, %cst_19 [0] : vector<8x32xf32> to vector<32xf32>
      %24 = vector.shape_cast %23 : vector<32xf32> to vector<1x32xf32>
      %cst_20 = arith.constant 6.250000e-02 : f32
      %25 = vector.broadcast %cst_20 : f32 to vector<1x32xf32>
      %26 = arith.mulf %24, %25 : vector<1x32xf32>
      %27 = arith.mulf %21, %21 : vector<1x32xf32>
      %28 = arith.subf %26, %27 : vector<1x32xf32>
      %cst_21 = arith.constant 0.000000e+00 : f32
      %29 = vector.broadcast %cst_21 : f32 to vector<1x32xf32>
      %30 = arith.maximumf %28, %29 : vector<1x32xf32>
      %cst_22 = arith.constant 9.99999974E-6 : f32
      %31 = vector.broadcast %cst_22 : f32 to vector<1x32xf32>
      %32 = arith.addf %30, %31 : vector<1x32xf32>
      %33 = math.rsqrt %32 : vector<1x32xf32>
      %c0_23 = arith.constant 0 : index
      %c0_24 = arith.constant 0 : index
      %34 = vector.load %arg2[%c0_23, %c0_24] : memref<1x32xf32, #tpu.memory_space<vmem>>, vector<1x32xf32>
      %c0_25 = arith.constant 0 : index
      %c0_26 = arith.constant 0 : index
      %35 = vector.load %arg3[%c0_25, %c0_26] : memref<1x32xf32, #tpu.memory_space<vmem>>, vector<1x32xf32>
      %36 = arith.mulf %34, %33 : vector<1x32xf32>
      %c0_27 = arith.constant 0 : index
      %c0_28 = arith.constant 0 : index
      %37 = vector.load %arg4[%c0_27, %c0_28] : memref<1x32xf32, #tpu.memory_space<vmem>>, vector<1x32xf32>
      tpu.vector_store %arg4[%c0_27, %c0_28], %36 {strides = array<i32>} : memref<1x32xf32, #tpu.memory_space<vmem>>, vector<1x32xf32>,
      %38 = arith.mulf %21, %36 : vector<1x32xf32>
      %39 = arith.subf %35, %38 : vector<1x32xf32>
      %c0_29 = arith.constant 0 : index
      %c0_30 = arith.constant 0 : index
      %40 = vector.load %arg5[%c0_29, %c0_30] : memref<1x32xf32, #tpu.memory_space<vmem>>, vector<1x32xf32>
      tpu.vector_store %arg5[%c0_29, %c0_30], %39 {strides = array<i32>} : memref<1x32xf32, #tpu.memory_space<vmem>>, vector<1x32xf32>,
    } else {
    }
    return
  }
  func.func @transform_0(%arg0: i32) -> (i32, i32) {
    %c0_i32 = arith.constant 0 : i32
    %c0_i32_0 = arith.constant 0 : i32
    return %arg0, %c0_i32 : i32, i32
  }
  func.func @transform_1(%arg0: i32) -> (i32, i32) {
    %c0_i32 = arith.constant 0 : i32
    %c0_i32_0 = arith.constant 0 : i32
    %c0_i32_1 = arith.constant 0 : i32
    return %c0_i32, %c0_i32_0 : i32, i32
  }
  func.func @transform_2(%arg0: i32) -> (i32, i32) {
    %c0_i32 = arith.constant 0 : i32
    %c0_i32_0 = arith.constant 0 : i32
    %c0_i32_1 = arith.constant 0 : i32
    return %c0_i32, %c0_i32_0 : i32, i32
  }
  func.func @transform_3(%arg0: i32) -> (i32, i32) {
    %c0_i32 = arith.constant 0 : i32
    %c0_i32_0 = arith.constant 0 : i32
    %c0_i32_1 = arith.constant 0 : i32
    return %c0_i32, %c0_i32_0 : i32, i32
  }
  func.func @transform_4(%arg0: i32) -> (i32, i32) {
    %c0_i32 = arith.constant 0 : i32
    %c0_i32_0 = arith.constant 0 : i32
    %c0_i32_1 = arith.constant 0 : i32
    return %c0_i32, %c0_i32_0 : i32, i32
  }
}

</mosaic_0001>

<bundles_post_ra>
// kernel: tpu_custom_call.1
= control target key start
LH: loop header
LB: loop body
LE: loop exit
PB: predicated region body
PF: predicated region fallthrough
CT: control target
= control target key end

     0   :  { %10 = vsyncpa [#allocation5], 0  ;;  %s284_s0 = inlined_call_operand.hbm [shape: f32[16,32], index: 0, kind: input, shape index: {}]   ;;  %s285_s1 = inlined_call_operand.vmem [shape: f32[1,32], index: 1, kind: input, shape index: {}]   ;;  %s286_s2 = inlined_call_operand.vmem [shape: f32[1,32], index: 2, kind: input, shape index: {}]   ;;  %s287_s3 = inlined_call_operand.hbm [shape: f32[1,32], index: 3, kind: output, shape index: {0}]   ;;  %s288_s4 = inlined_call_operand.hbm [shape: f32[1,32], index: 4, kind: output, shape index: {1}]  }
   0x1   :  { %11 = vsyncpa [#allocation6], 0 }
   0x2   :  { %12 = vsyncpa [#allocation9], 0  ;;  %s199_s15 = smov [#allocation4]   ;;  %s127_s19 = scalar_lea.hbm %s284_s0, 256 }
   0x3   :  { %s18_s16 = sshll.u32 %s199_s15, 4  ;;  %p128_p0 = scmp.ne.s32.totalorder %s284_s0, %s127_s19  ;;  %s19_s16 = int_to_ptr.vmem [resolvable:$true] %s18_s16 }
   0x4   :  { %p131_p1 = scmp.lt.u32.totalorder %s127_s19, %s284_s0 }
   0x6   :  { %p133_p2 = pnand %p131_p1, %p128_p0 }
   0x8   :  { %136 = shalt.err (!%p133_p2)
}
   0x9   :  { %s137_s24 = scalar_lea.vmem %s19_s16, 256  ;;  %p142_p4 = scmp.lt.s32.totalorder %s19_s16, %s19_s16 }
   0xa   :  { %p138_p3 = scmp.ne.s32.totalorder %s19_s16, %s137_s24  ;;  %p143_p5 = scmp.lt.s32.totalorder %s137_s24, %s137_s24 }
   0xc   :  { %p144_p6 = por %p143_p5, %p142_p4 }
   0xe   :  { %p145_p7 = pnand %p144_p6, %p138_p3 }
  0x10   :  { %148 = shalt.err (!%p145_p7)
}
  0x11   :  { %s200_s25 = smov 128   ;;  %s201_s26 = smov 8  }
  0x12   :  { %24 = dma.hbm_to_vmem [thread:$0]  %s284_s0, 256, %s19_s16, [#allocation5], %s200_s25, %s200_s25, %s201_s26  }
  0x13   :  { %193 = dma.done.wait [#allocation5], 256  }
  0x14   :  { %194 = vsyncadd [#allocation5], 4294967040  ;;  %vm36_vm0 = vcmask 261120   ;;  %v202_v0 = vmov 0.0   ;;  %v39_v1 = vld [vmem:[#allocation4] sm:$0xff]  ;;  %v40_v2 = vld [vmem:[#allocation4 + $0x8] sm:$0xff] }
  0x15   :  { %37 = vst.msk [vmem:[#allocation2] sm:$0xff] %vm36_vm0, %v202_v0  ;;  %38 = vst.msk [vmem:[#allocation3] sm:$0xff] %vm36_vm0, %v202_v0  ;;  %v43_v4 = vsel %vm36_vm0, %v39_v1, 0.0  ;;  %v44_v5 = vsel %vm36_vm0, %v40_v2, 0.0  ;;  %v49_v6 = vmul.f32 %v39_v1, %v39_v1  ;;  %v50_v7 = vmul.f32 %v40_v2, %v40_v2  ;;  %v82_v37 = vld [vmem:[%s285_s1] sm:$0x1] }
  0x16   :  { %v45_v8 = vadd.f32 %v44_v5, %v43_v4  ;;  %s203_s30 = smov [#allocation7]   ;;  %vm85_vm1 = vcmask 253952   ;;  %v83_v40 = vld [vmem:[%s286_s2] sm:$0x1]  ;;  %s204_s8 = smov [#allocation8]  }
  0x17   :  { %v51_v10 = vsel %vm36_vm0, %v49_v6, 0.0  ;;  %v52_v11 = vsel %vm36_vm0, %v50_v7, 0.0  ;;  %s96_s5 = sshll.u32 %s203_s30, 4  ;;  %s106_s9 = sshll.u32 %s204_s8, 4  ;;  %s97_s5 = int_to_ptr.vmem [resolvable:$true] %s96_s5  ;;  %s107_s9 = int_to_ptr.vmem [resolvable:$true] %s106_s9 }
  0x18   :  { %v53_v13 = vadd.f32 %v52_v11, %v51_v10  ;;  %s149_s10 = scalar_lea.vmem %s97_s5, 16  ;;  %s153_s11 = scalar_lea.vmem %s97_s5, 32 }
  0x19   :  { %p150_p8 = scmp.ne.s32.totalorder %s97_s5, %s149_s10  ;;  %p154_p9 = scmp.lt.s32.totalorder %s97_s5, %s97_s5 }
  0x1a   :  { %p155_p10 = scmp.lt.s32.totalorder %s153_s11, %s149_s10 }
  0x1c   :  { %v41_v3 = vld [vmem:[#allocation2] sm:$0xff]  ;;  %v48_v9 = vld [vmem:[#allocation3] sm:$0xff]  ;;  %p156_p11 = por %p155_p10, %p154_p9 }
  0x1d   :  { %v46_v12 = vadd.f32 %v45_v8, %v41_v3  ;;  %v54_v14 = vadd.f32 %v53_v13, %v48_v9 }
  0x1e   :  { %p157_p12 = pnand %p156_p11, %p150_p8 }
  0x1f   :  { %47 = vst.msk [vmem:[#allocation2] sm:$0xff] %vm36_vm0, %v46_v12  ;;  %55 = vst.msk [vmem:[#allocation3] sm:$0xff] %vm36_vm0, %v54_v14 }
  0x26   :  { %v59_v15 = vld [vmem:[#allocation2] sm:$0xff]  ;;  %v68_v18 = vld [vmem:[#allocation3] sm:$0xff] }
  0x27   :  { %v60_v16 = vsel %vm36_vm0, %v59_v15, 0.0  ;;  %v69_v19 = vsel %vm36_vm0, %v68_v18, 0.0 }
  0x28   :  { %v61_v17 = vrot.slane %v60_v16, 4  ;;  %v70_v21 = vrot.slane %v69_v19, 4 }
  0x2a   :  { %v62_v20 = vadd.f32 %v61_v17, %v60_v16  ;;  %v71_v23 = vadd.f32 %v70_v21, %v69_v19 }
  0x2c   :  { %v63_v22 = vrot.slane %v62_v20, 2  ;;  %v72_v25 = vrot.slane %v71_v23, 2 }
  0x2e   :  { %v64_v24 = vadd.f32 %v63_v22, %v62_v20  ;;  %v73_v27 = vadd.f32 %v72_v25, %v71_v23 }
  0x30   :  { %v65_v26 = vrot.slane %v64_v24, 1  ;;  %v74_v29 = vrot.slane %v73_v27, 1 }
  0x32   :  { %v66_v28 = vadd.f32 %v65_v26, %v64_v24  ;;  %v75_v31 = vadd.f32 %v74_v29, %v73_v27 }
  0x34   :  { %v67_v30 = vmul.f32 0.0625, %v66_v28  ;;  %v76_v32 = vmul.f32 0.0625, %v75_v31 }
  0x36   :  { %v77_v33 = vmul.f32 %v67_v30, %v67_v30 }
  0x38   :  { %v78_v34 = vsub.f32 %v76_v32, %v77_v33 }
  0x3a   :  { %v79_v35 = vmax.f32 %v78_v34, 0.0 }
  0x3c   :  { %v80_v36 = vadd.f32 1e-05, %v79_v35 }
  0x3e   :  { %125 = vrsqrt.f32 %v80_v36 }
  0x48   :  { %v126_v38 = vpop.eup %125 }
  0x49   :  { %v84_v39 = vmul.f32 %v126_v38, %v82_v37 }
  0x4b   :  { %86 = vst.msk [vmem:[#allocation7] sm:$0x1] %vm85_vm1, %v84_v39  ;;  %v87_v41 = vmul.f32 %v84_v39, %v67_v30 }
  0x4c   :  { %160 = shalt.err (!%p157_p12)
}
  0x4d   :  { %s161_s13 = scalar_lea.hbm %s287_s3, 16 }
  0x4e   :  { %p162_p13 = scmp.ne.s32.totalorder %s287_s3, %s161_s13  ;;  %p165_p0 = scmp.lt.u32.totalorder %s161_s13, %s287_s3 }
  0x50   :  { %p167_p1 = pnand %p165_p0, %p162_p13 }
  0x52   :  { %170 = shalt.err (!%p167_p1)
}
  0x53   :  { %99 = dma.vmem_to_hbm [thread:$0]  %s97_s5, 16, %s287_s3, [#allocation6]   ;;  %v88_v42 = vsub.f32 %v83_v40, %v87_v41 }
  0x54   :  { %s171_s19 = scalar_lea.vmem %s107_s9, 16  ;;  %s175_s20 = scalar_lea.vmem %s107_s9, 32 }
  0x55   :  { %89 = vst.msk [vmem:[#allocation8] sm:$0x1] %vm85_vm1, %v88_v42  ;;  %p172_p2 = scmp.ne.s32.totalorder %s107_s9, %s171_s19  ;;  %p176_p3 = scmp.lt.s32.totalorder %s107_s9, %s107_s9 }
  0x56   :  { %p177_p4 = scmp.lt.s32.totalorder %s175_s20, %s171_s19 }
  0x58   :  { %p178_p5 = por %p177_p4, %p176_p3 }
  0x5a   :  { %p179_p6 = pnand %p178_p5, %p172_p2 }
  0x5c   :  { %182 = shalt.err (!%p179_p6)
}
  0x5d   :  { %s183_s23 = scalar_lea.hbm %s288_s4, 16 }
  0x5e   :  { %p184_p7 = scmp.ne.s32.totalorder %s288_s4, %s183_s23  ;;  %p187_p8 = scmp.lt.u32.totalorder %s183_s23, %s288_s4 }
  0x60   :  { %p189_p9 = pnand %p187_p8, %p184_p7 }
  0x62   :  { %192 = shalt.err (!%p189_p9)
}
  0x63   :  { %109 = dma.vmem_to_hbm [thread:$0]  %s107_s9, 16, %s288_s4, [#allocation9]  }
  0x64   :  { %195 = dma.done.wait [#allocation6], 16  }
  0x65   :  { %196 = vsyncadd [#allocation6], 4294967280 }
  0x66   :  { %197 = dma.done.wait [#allocation9], 16  }
  0x67   :  { %198 = vsyncadd [#allocation9], 4294967280 }
  0x68   :  { %116 = vsyncpa [#allocation5], 1 }
  0x69   :  { %117 = vsyncpa [#allocation6], 1 }
  0x6a   :  { %118 = vsyncpa [#allocation9], 1 }

</bundles_post_ra>
